<compile_context>
chip_gen: v7x
topology: tpu7x:2x2x1
jax: 0.10.0
libtpu: 0.0.40
codegen_flags: <defaults>
</compile_context>

<pallas_src>
import functools

import jax
import jax.numpy as jnp
from jax import lax
from jax.experimental import pallas as pl
from jax.experimental.pallas import tpu as pltpu

_LANES = 128
_GOLDEN = 0x9E3779B9                       # 2^32 / golden ratio (odd -> bijective mul)
_ROW_MULT = (_LANES * _GOLDEN) & 0xFFFFFFFF
_TARGET_BLOCK_BYTES = 2 * 1024 * 1024      # ~2 MiB per block


def _mix32(v):
    """lowbias32-style 32-bit integer mix (uint32 in, uint32 out)."""
    v = v ^ (v >> jnp.uint32(16))
    v = v * jnp.uint32(0x7FEB352D)
    v = v ^ (v >> jnp.uint32(15))
    v = v * jnp.uint32(0x846CA68B)
    v = v ^ (v >> jnp.uint32(16))
    return v


def _spectral_mask_kernel(seed_ref, keep_ref, x_ref, o_ref, *, thr16, tile_rows):
    """One (spatial-tile, batch) block per grid step.

    seed_ref : SMEM int32[1]     base seed (scalar prefetch)
    keep_ref : SMEM int32[B]     per-batch keep bit (rand < mask_prob)
    x_ref    : VMEM (tile_rows, 128)   (batch dim squeezed away)
    o_ref    : VMEM (tile_rows, 128)
    """
    t = pl.program_id(0)          # spatial tile (leading, larger grid axis)
    b = pl.program_id(1)          # batch element
    batch_keep = keep_ref[b]

    # Batch fully kept -> pure copy, skip all PRNG / compare / select work.
    @pl.when(batch_keep != 0)
    def _copy_through():
        o_ref[...] = x_ref[...]

    # Otherwise apply the per-element Bernoulli(p) mask.
    @pl.when(batch_keep == 0)
    def _element_mask():
        n_lo = tile_rows // 2          # rows served by the low 16 hash bits
        n_hi = tile_rows - n_lo        # rows served by the high 16 hash bits

        # Scalar part of the hashed index (scalar unit, not VPU).
        seed_u = seed_ref[0].astype(jnp.uint32)
        b_u = b.astype(jnp.uint32)
        t_u = t.astype(jnp.uint32)
        base = _mix32(seed_u + b_u * jnp.uint32(_GOLDEN))
        base = base + t_u * jnp.uint32((n_hi * _ROW_MULT) & 0xFFFFFFFF)

        # Vector part: row*ROW_MULT + lane*GOLDEN  ==  flat_index * GOLDEN.
        row = lax.broadcasted_iota(jnp.uint32, (n_hi, _LANES), 0)
        lane = lax.broadcasted_iota(jnp.uint32, (n_hi, _LANES), 1)
        bits = _mix32(base + row * jnp.uint32(_ROW_MULT)
                      + lane * jnp.uint32(_GOLDEN))

        # Two Bernoulli(p) decisions per 32-bit hash word.
        #   high half:  (bits >> 16) < thr16  <=>  bits < (thr16 << 16)
        keep_hi = bits < jnp.uint32((thr16 << 16) & 0xFFFFFFFF)
        x_hi = x_ref[n_lo:, :]
        o_ref[n_lo:, :] = jnp.where(keep_hi, x_hi, jnp.zeros_like(x_hi))

        if n_lo > 0:
            keep_lo = (bits[:n_lo] & jnp.uint32(0xFFFF)) < jnp.uint32(thr16)
            x_lo = x_ref[:n_lo, :]
            o_ref[:n_lo, :] = jnp.where(keep_lo, x_lo, jnp.zeros_like(x_lo))


def random_spectral_mask(x, seed, *, mask_prob: float = 0.5, p: float = 0.5,
                         training: bool = True):
    """JAX/Pallas equivalent of RandomSpectralMask.forward.

    x    : (B, C, H, W) float array (NCHW, same as PyTorch)
    seed : python int, base PRNG seed.  Random stream differs from torch.rand
           but the Bernoulli(p) / Bernoulli(mask_prob) semantics are identical
           (p quantized to 1/65536).
    """
    if (not training) or mask_prob == 0:       # exact torch early-out
        return x
    if p >= 1.0:                               # rand() in [0,1) < 1.0 is always true
        return x

    B, C, H, W = x.shape
    N = C * H * W
    itemsize = jnp.dtype(x.dtype).itemsize

    # Lane-dense (B, S, 128) view; copy-free when N is 128-aligned.
    padded = (N % _LANES) != 0
    if padded:
        # TODO(synk): split ragged shapes into an aligned bulk kernel call plus a
        # tiny XLA tail to avoid this extra HBM round trip.
        n_pad = ((N + _LANES - 1) // _LANES) * _LANES
        x_flat = jnp.pad(x.reshape(B, N), ((0, 0), (0, n_pad - N)))
    else:
        n_pad = N
        x_flat = x.reshape(B, N)
    S = n_pad // _LANES
    x3 = x_flat.reshape(B, S, _LANES)

    # ~2 MiB blocks, rows a multiple of 16 so the lo/hi half-split stays
    # (8,128)-tile aligned.  in + out, double-buffered -> ~8 MiB VMEM.
    max_rows = max(16, (_TARGET_BLOCK_BYTES // (_LANES * itemsize)) // 16 * 16)
    St = S if S <= max_rows else max_rows
    n_tiles = (S + St - 1) // St

    # uniform(0,1) < p  <=>  16-bit hash value < p * 2^16
    thr16 = max(0, min(int(round(p * 65536.0)), 65535))

    seed_i32 = int(seed) & 0x7FFFFFFF
    batch_keep = (jax.random.uniform(jax.random.PRNGKey(seed_i32), (B,))
                  < mask_prob).astype(jnp.int32)
    seed_arr = jnp.asarray([seed_i32], dtype=jnp.int32)

    kernel = functools.partial(_spectral_mask_kernel, thr16=thr16, tile_rows=St)

    out3 = pl.pallas_call(
        kernel,
        out_shape=jax.ShapeDtypeStruct((B, S, _LANES), x.dtype),
        grid_spec=pltpu.PrefetchScalarGridSpec(
            num_scalar_prefetch=2,
            grid=(n_tiles, B),   # larger (spatial) axis leads -> even v7x TC split
            in_specs=[pl.BlockSpec((pl.Squeezed(), St, _LANES),
                                   lambda t, b, seed_ref, keep_ref: (b, t, 0))],
            out_specs=pl.BlockSpec((pl.Squeezed(), St, _LANES),
                                   lambda t, b, seed_ref, keep_ref: (b, t, 0)),
        ),
        compiler_params=pltpu.CompilerParams(
            dimension_semantics=("parallel", "parallel"),
            vmem_limit_bytes=32 * 1024 * 1024),
        cost_estimate=pl.CostEstimate(
            flops=B * S * _LANES,
            transcendentals=0,
            bytes_accessed=2 * B * S * _LANES * itemsize),
    )(seed_arr, batch_keep, x3)

    if padded:
        return out3.reshape(B, n_pad)[:, :N].reshape(B, C, H, W)
    return out3.reshape(B, C, H, W)


if __name__ == "__main__":
    key = jax.random.PRNGKey(0)
    B, C, H, W = 2, 4, 16, 16
    x = jax.random.normal(key, (B, C, H, W), dtype=jnp.float32)

    out = random_spectral_mask(x, seed=1234, mask_prob=0.5, p=0.5, training=True)
    out = jax.block_until_ready(out)

    # Every output element is either exactly x (kept) or exactly 0 (masked).
    kept_or_zero = jnp.logical_or(out == x, out == 0.0)
    assert bool(jnp.all(kept_or_zero)), "mask must only keep or zero elements"
    assert out.shape == x.shape and out.dtype == x.dtype

    # With mask_prob ~ 0 (but nonzero, so no early-out) only the element mask
    # applies -> keep fraction should be ~p.
    out_p = jax.block_until_ready(
        random_spectral_mask(x, seed=42, mask_prob=1e-9, p=0.5, training=True))
    frac = float(jnp.mean((out_p != 0.0).astype(jnp.float32)))
    assert 0.35 < frac < 0.65, f"keep fraction {frac} not near p=0.5"

    # Eval mode / mask_prob == 0 is identity.
    out_eval = random_spectral_mask(x, seed=1234, training=False)
    assert bool(jnp.all(out_eval == x))

    # Ragged-shape fallback path (C*H*W not 128-aligned).
    x2 = jax.random.normal(key, (2, 3, 5, 7), dtype=jnp.float32)
    out2 = jax.block_until_ready(
        random_spectral_mask(x2, seed=7, mask_prob=0.5, p=0.5, training=True))
    assert out2.shape == x2.shape
    assert bool(jnp.all(jnp.logical_or(out2 == x2, out2 == 0.0)))

    print("KERNEL_OK")
</pallas_src>

<mosaic_0001>
module attributes {stable_mosaic.version = 11 : i64} {
  func.func @_spectral_mask_kernel(%arg0: i32, %arg1: i32, %arg2: memref<1xi32, #tpu.memory_space<smem>>, %arg3: memref<2xi32, #tpu.memory_space<smem>>, %arg4: memref<1x8x128xf32, #tpu.memory_space<vmem>>, %arg5: memref<1x8x128xf32, #tpu.memory_space<vmem>>) attributes {dimension_semantics = [#tpu.dimension_semantics<parallel>, #tpu.dimension_semantics<parallel>], iteration_bounds = array<i64: 1, 2>, scalar_prefetch = 2 : i64, scratch_operands = 0 : i64, tpu.core_type = #tpu.core_type<tc>, window_params = [{transform_indices = @transform_0, window_bounds = array<i64: 1, 8, 128>}, {transform_indices = @transform_1, window_bounds = array<i64: 1, 8, 128>}]} {
    %0 = arith.index_cast %arg1 : i32 to index
    %1 = memref.load %arg3[%0] : memref<2xi32, #tpu.memory_space<smem>>
    %c0_i32 = arith.constant 0 : i32
    %2 = arith.cmpi ne, %1, %c0_i32 : i32
    %3 = arith.extui %2 : i1 to i32
    %c0_i32_0 = arith.constant 0 : i32
    %4 = arith.cmpi ne, %3, %c0_i32_0 : i32
    scf.if %4 {
      %c0 = arith.constant 0 : index
      %c0_3 = arith.constant 0 : index
      %c0_4 = arith.constant 0 : index
      %8 = vector.load %arg4[%c0, %c0_3, %c0_4] : memref<1x8x128xf32, #tpu.memory_space<vmem>>, vector<1x8x128xf32>
      %9 = vector.shape_cast %8 : vector<1x8x128xf32> to vector<8x128xf32>
      %c0_5 = arith.constant 0 : index
      %c0_6 = arith.constant 0 : index
      %c0_7 = arith.constant 0 : index
      %10 = vector.load %arg5[%c0_5, %c0_6, %c0_7] : memref<1x8x128xf32, #tpu.memory_space<vmem>>, vector<1x8x128xf32>
      %11 = vector.shape_cast %10 : vector<1x8x128xf32> to vector<8x128xf32>
      %12 = vector.shape_cast %9 : vector<8x128xf32> to vector<1x8x128xf32>
      tpu.vector_store %arg5[%c0_5, %c0_6, %c0_7], %12 {strides = array<i32>} : memref<1x8x128xf32, #tpu.memory_space<vmem>>, vector<1x8x128xf32>,
    } else {
    }
    %c0_i32_1 = arith.constant 0 : i32
    %5 = arith.cmpi eq, %1, %c0_i32_1 : i32
    %6 = arith.extui %5 : i1 to i32
    %c0_i32_2 = arith.constant 0 : i32
    %7 = arith.cmpi ne, %6, %c0_i32_2 : i32
    scf.if %7 {
      %c0 = arith.constant 0 : index
      %8 = memref.load %arg2[%c0] : memref<1xi32, #tpu.memory_space<smem>>
      %c-1640531527_i32 = arith.constant -1640531527 : i32
      %9 = arith.muli %arg1, %c-1640531527_i32 : i32
      %10 = arith.addi %8, %9 : i32
      %c16_i32 = arith.constant 16 : i32
      %11 = arith.shrui %10, %c16_i32 : i32
      %12 = arith.xori %10, %11 : i32
      %c2146121005_i32 = arith.constant 2146121005 : i32
      %13 = arith.muli %12, %c2146121005_i32 : i32
      %c15_i32 = arith.constant 15 : i32
      %14 = arith.shrui %13, %c15_i32 : i32
      %15 = arith.xori %13, %14 : i32
      %c-2073254261_i32 = arith.constant -2073254261 : i32
      %16 = arith.muli %15, %c-2073254261_i32 : i32
      %c16_i32_3 = arith.constant 16 : i32
      %17 = arith.shrui %16, %c16_i32_3 : i32
      %18 = arith.xori %16, %17 : i32
      %c1861448192_i32 = arith.constant 1861448192 : i32
      %19 = arith.muli %arg0, %c1861448192_i32 : i32
      %20 = arith.addi %18, %19 : i32
      %21 = tpu.iota {dimensions = array<i32: 0>} : vector<4x128xi32>
      %22 = tpu.iota {dimensions = array<i32: 1>} : vector<4x128xi32>
      %c465362048_i32 = arith.constant 465362048 : i32
      %23 = vector.broadcast %c465362048_i32 : i32 to vector<4x128xi32>
      %24 = arith.muli %21, %23 : vector<4x128xi32>
      %25 = vector.broadcast %20 : i32 to vector<4x128xi32>
      %26 = arith.addi %25, %24 : vector<4x128xi32>
      %c-1640531527_i32_4 = arith.constant -1640531527 : i32
      %27 = vector.broadcast %c-1640531527_i32_4 : i32 to vector<4x128xi32>
      %28 = arith.muli %22, %27 : vector<4x128xi32>
      %29 = arith.addi %26, %28 : vector<4x128xi32>
      %c16_i32_5 = arith.constant 16 : i32
      %30 = vector.broadcast %c16_i32_5 : i32 to vector<4x128xi32>
      %31 = arith.shrui %29, %30 : vector<4x128xi32>
      %32 = arith.xori %29, %31 : vector<4x128xi32>
      %c2146121005_i32_6 = arith.constant 2146121005 : i32
      %33 = vector.broadcast %c2146121005_i32_6 : i32 to vector<4x128xi32>
      %34 = arith.muli %32, %33 : vector<4x128xi32>
      %c15_i32_7 = arith.constant 15 : i32
      %35 = vector.broadcast %c15_i32_7 : i32 to vector<4x128xi32>
      %36 = arith.shrui %34, %35 : vector<4x128xi32>
      %37 = arith.xori %34, %36 : vector<4x128xi32>
      %c-2073254261_i32_8 = arith.constant -2073254261 : i32
      %38 = vector.broadcast %c-2073254261_i32_8 : i32 to vector<4x128xi32>
      %39 = arith.muli %37, %38 : vector<4x128xi32>
      %c16_i32_9 = arith.constant 16 : i32
      %40 = vector.broadcast %c16_i32_9 : i32 to vector<4x128xi32>
      %41 = arith.shrui %39, %40 : vector<4x128xi32>
      %42 = arith.xori %39, %41 : vector<4x128xi32>
      %c-2147483648_i32 = arith.constant -2147483648 : i32
      %43 = vector.broadcast %c-2147483648_i32 : i32 to vector<4x128xi32>
      %44 = arith.cmpi ult, %42, %43 : vector<4x128xi32>
      %c0_10 = arith.constant 0 : index
      %c4 = arith.constant 4 : index
      %c0_11 = arith.constant 0 : index
      %45 = vector.load %arg4[%c0_10, %c4, %c0_11] : memref<1x8x128xf32, #tpu.memory_space<vmem>>, vector<1x4x128xf32>
      %46 = vector.shape_cast %45 : vector<1x4x128xf32> to vector<4x128xf32>
      %cst = arith.constant 0.000000e+00 : f32
      %47 = vector.broadcast %cst : f32 to vector<4x128xf32>
      %48 = arith.select %44, %46, %47 : vector<4x128xi1>, vector<4x128xf32>
      %c0_12 = arith.constant 0 : index
      %c4_13 = arith.constant 4 : index
      %c0_14 = arith.constant 0 : index
      %49 = vector.load %arg5[%c0_12, %c4_13, %c0_14] : memref<1x8x128xf32, #tpu.memory_space<vmem>>, vector<1x4x128xf32>
      %50 = vector.shape_cast %49 : vector<1x4x128xf32> to vector<4x128xf32>
      %51 = vector.shape_cast %48 : vector<4x128xf32> to vector<1x4x128xf32>
      tpu.vector_store %arg5[%c0_12, %c4_13, %c0_14], %51 {strides = array<i32>} : memref<1x8x128xf32, #tpu.memory_space<vmem>>, vector<1x4x128xf32>,
      %c65535_i32 = arith.constant 65535 : i32
      %52 = vector.broadcast %c65535_i32 : i32 to vector<4x128xi32>
      %53 = arith.andi %42, %52 : vector<4x128xi32>
      %c32768_i32 = arith.constant 32768 : i32
      %54 = vector.broadcast %c32768_i32 : i32 to vector<4x128xi32>
      %55 = arith.cmpi ult, %53, %54 : vector<4x128xi32>
      %c0_15 = arith.constant 0 : index
      %c0_16 = arith.constant 0 : index
      %c0_17 = arith.constant 0 : index
      %56 = vector.load %arg4[%c0_15, %c0_16, %c0_17] : memref<1x8x128xf32, #tpu.memory_space<vmem>>, vector<1x4x128xf32>
      %57 = vector.shape_cast %56 : vector<1x4x128xf32> to vector<4x128xf32>
      %cst_18 = arith.constant 0.000000e+00 : f32
      %58 = vector.broadcast %cst_18 : f32 to vector<4x128xf32>
      %59 = arith.select %55, %57, %58 : vector<4x128xi1>, vector<4x128xf32>
      %c0_19 = arith.constant 0 : index
      %c0_20 = arith.constant 0 : index
      %c0_21 = arith.constant 0 : index
      %60 = vector.load %arg5[%c0_19, %c0_20, %c0_21] : memref<1x8x128xf32, #tpu.memory_space<vmem>>, vector<1x4x128xf32>
      %61 = vector.shape_cast %60 : vector<1x4x128xf32> to vector<4x128xf32>
      %62 = vector.shape_cast %59 : vector<4x128xf32> to vector<1x4x128xf32>
      tpu.vector_store %arg5[%c0_19, %c0_20, %c0_21], %62 {strides = array<i32>} : memref<1x8x128xf32, #tpu.memory_space<vmem>>, vector<1x4x128xf32>,
    } else {
    }
    return
  }
  func.func @transform_0(%arg0: i32, %arg1: i32, %arg2: memref<1xi32, #tpu.memory_space<smem>>, %arg3: memref<2xi32, #tpu.memory_space<smem>>) -> (i32, i32, i32) {
    %c0_i32 = arith.constant 0 : i32
    %c0_i32_0 = arith.constant 0 : i32
    return %arg1, %arg0, %c0_i32 : i32, i32, i32
  }
  func.func @transform_1(%arg0: i32, %arg1: i32, %arg2: memref<1xi32, #tpu.memory_space<smem>>, %arg3: memref<2xi32, #tpu.memory_space<smem>>) -> (i32, i32, i32) {
    %c0_i32 = arith.constant 0 : i32
    %c0_i32_0 = arith.constant 0 : i32
    return %arg1, %arg0, %c0_i32 : i32, i32, i32
  }
}

</mosaic_0001>

<bundles_post_ra>
// kernel: tpu_custom_call.1
= control target key start
LH: loop header
LB: loop body
LE: loop exit
PB: predicated region body
PF: predicated region fallthrough
CT: control target
= control target key end

     0   :  { %s717_s0 = inlined_call_operand.<no memory space> [shape: s32[1], index: 0, kind: input, shape index: {}]   ;;  %s718_s1 = inlined_call_operand.vmem [shape: s32[2], index: 1, kind: input, shape index: {}]   ;;  %s719_s2 = inlined_call_operand.hbm [shape: f32[2,8,128], index: 2, kind: input, shape index: {}]   ;;  %s720_s3 = inlined_call_operand.hbm [shape: f32[2,8,128], index: 3, kind: output, shape index: {}]  }
   0x1   :  { %8 = sst [smem:[#allocation3]] %s717_s0  ;;  %s9_s16 = sshll.u32 %s718_s1, 4  ;;  %s10_s16 = int_to_ptr.vmem [resolvable:$true] %s9_s16 }
   0x2   :  { %s381_s17 = scalar_lea.vmem %s10_s16, 16  ;;  %p386_p1 = scmp.lt.s32.totalorder %s10_s16, %s10_s16 }
   0x3   :  { %p382_p0 = scmp.ne.s32.totalorder %s10_s16, %s381_s17  ;;  %p387_p2 = scmp.lt.s32.totalorder %s381_s17, %s381_s17 }
   0x5   :  { %p388_p3 = por %p387_p2, %p386_p1 }
   0x7   :  { %p389_p4 = pnand %p388_p3, %p382_p0 }
   0x9   :  { %392 = shalt.err (!%p389_p4)  }
   0xa   :  { %s509_s18 = smov [#allocation4]  }
   0xb   :  { %12 = dma.vmem_to_smem %s10_s16, 16, %s509_s18, [#allocation2] }
   0xc   :  { %475 = dma.done.wait [#allocation2], 16 }
   0xd   :  { %476 = vsyncadd [#allocation2], 4294967280 }
   0xe   :  { %14 = sfence }
   0xf   :  { %15 = vsyncpa [#allocation6], 0 }
  0x10   :  { %17 = vsyncpa [#allocation6 + $0x1], 0 }
  0x11   :  { %18 = vsyncpa [#allocation7], 0 }
  0x12   :  { %20 = vsyncpa [#allocation7 + $0x1], 0  ;;  %s538_s0 = smov 0   ;;  %s540_s1 = smov 0  }
  0x13   :  { %s542_s19 = smov 0   ;;  %s544_s20 = smov 0  }
  0x14   :  { %s546_s21 = smov 0   ;;  %s548_s22 = smov 0  }
  0x15 LB: > { %s303_s23 = sadd.s32 4294967295, %s507_s22   ;;  %s304_s24 = sadd.s32 4294967294, %s507_s22   ;;  %s507_s22 = sphi %s548_s22, %s26_s22   ;;  %s503_s21 = sphi %s546_s21, %s736_s21   ;;  %s499_s20 = sphi %s544_s20, %s735_s20   ;;  %s495_s19 = sphi %s542_s19, %s734_s19   ;;  %s491_s1 = sphi %s540_s1, %s733_s1   ;;  %s487_s0 = sphi %s538_s0, %s732_s0  }
  0x16   : > { %s35_s25 = sadd.s32 1, %s503_s21  ;;  %s47_s26 = sadd.s32 1, %s495_s19 }
  0x17   : > { %p36_p5 = scmp.ge.s32.totalorder %s35_s25, 2  ;;  %p54_p6 = scmp.ne.s32.totalorder %s495_s19, %s491_s1 }
  0x18   : > { %p55_p7 = scmp.eq.s32.totalorder %s507_s22, 0  ;;  %p60_p8 = scmp.ne.s32.totalorder %s491_s1, %s487_s0 }
  0x19   : > { %s738_s25 = smov (%p36_p5, %s35_s25), 0  ;;  %p61_p10 = scmp.eq.s32.totalorder %s303_s23, 0 }
  0x1a   : > { %p579_p9 = por %p55_p7, %p54_p6  ;;  %s42_s28 = ssub.s32 %s503_s21, %s738_s25 }
  0x1b   : > { %p86_p11 = scmp.eq.s32.totalorder %s303_s23, 1  ;;  %p45_p12 = scmp.eq.s32.totalorder %s42_s28, 0 }
  0x1c   : > { %p585_p13 = por %p61_p10, %p60_p8  ;;  %p92_p1 = scmp.eq.s32.totalorder %s304_s24, 1 }
  0x1d   : > { %p589_p0 = por %p86_p11, %p54_p6  ;;  %p330_p4 = scmp.lt.s32.totalorder %s507_s22, 2 }
  0x1e   : > { %s594_s4 = scalar_select %p45_p12, %s495_s19, %s47_s26  }
  0x1f   : > { %s724_s30 = scalar_select %p589_p0, 1, 0 }
  0x20   : > { %p596_p2 = por %p92_p1, %p60_p8  ;;  %s112_s6 = sand.u32 1, %s495_s19  }
  0x21   : > { %s307_s7 = sshll.u32 %s112_s6, 3  ;;  %s308_s8 = sshll.u32 %s503_s21, 7 }
  0x22   : > { %s725_s5 = scalar_select %p596_p2, 1, 0 }
  0x23   : > { %s607_s11 = scalar_lea.hbm %s719_s2, %s308_s8  ;;  %s116_s12 = scalar_lea.vmem [#allocation5], %s307_s7 }
  0x24   : > { %s124_s13 = sshll.u32 %s116_s12, 4  ;;  %p613_p5 = pnand %p330_p4, %p579_p9  ;;  %s609_s13 = int_to_ptr.vmem [resolvable:$true] %s124_s13 }
  0x25   : > { %s113_s15 = scalar_lea.sflag [#allocation6], %s112_s6  ;;  %s393_s16 = scalar_lea.hbm %s607_s11, 128 }
  0x26   : > { %p394_p8 = scmp.ne.s32.totalorder %s607_s11, %s393_s16  ;;  %p395_p10 = pneg %p613_p5 }
  0x27   : > { %s398_s23 = scalar_lea.hbm %s719_s2, 256  ;;  %p399_p9 = scmp.lt.u32.totalorder %s607_s11, %s719_s2 }
  0x28   : > { %p396_p11 = pnand %p395_p10, %p394_p8  ;;  %p400_p1 = scmp.lt.u32.totalorder %s398_s23, %s393_s16 }
  0x29   : > { %p402_p3 = scmp.lt.u32.totalorder %s393_s16, %s607_s11 }
  0x2a   : > { %p397_p12 = pneg %p396_p11  ;;  %p401_p4 = por %p400_p1, %p399_p9 }
  0x2c   : > { %p403_p6 = por %p402_p3, %p401_p4 }
  0x2e   : > { %p404_p7 = pnand %p403_p6, %p397_p12 }
  0x30   : > { %407 = shalt.err (!%p404_p7)
}
  0x31   : > { %s408_s27 = scalar_lea.vmem %s609_s13, 128  ;;  %s510_s28 = smov [#allocation5]  }
  0x32   : > { %p409_p8 = scmp.ne.s32.totalorder %s609_s13, %s408_s27  ;;  %s413_s6 = sshll.u32 %s510_s28, 4  ;;  %s414_s6 = int_to_ptr.vmem [resolvable:$false] %s413_s6 }
  0x33   : > { %s415_s7 = scalar_lea.vmem %s414_s6, 256  ;;  %p416_p0 = scmp.lt.s32.totalorder %s609_s13, %s414_s6 }
  0x34   : > { %p411_p11 = pnand %p409_p8, %p395_p10  ;;  %p417_p9 = scmp.lt.s32.totalorder %s415_s7, %s408_s27 }
  0x36   : > { %p412_p2 = pneg %p411_p11  ;;  %p418_p1 = por %p417_p9, %p416_p0 }
  0x38   : > { %p419_p3 = pnand %p418_p1, %p412_p2 }
  0x3a   : > { %422 = shalt.err (!%p419_p3)
}
  0x3b   : > { %325 = dma.hbm_to_vmem [thread:$0]  (!%p613_p5), %s607_s11, 128, %s609_s13, %s113_s15  }
  0x3c   : > { %p727_p6 = scmp.lt.s32.totalorder %s507_s22, 3  ;;  %p728_p7 = scmp.ge.s32.totalorder %s507_s22, 1 }
  0x3e   : > { %p130_p10 = pnand %p728_p7, %p727_p6 }
  0x3f   : > { %s649_s8 = sand.u32 (!%p130_p10), 1, %s491_s1  }
  0x40   : > { %133 = sbr.rel (%p130_p10) target bundleno = 156 (0x9c), region = 24  ;;  %s310_s9 = sshll.u32 (!%p130_p10), %s649_s8, 3 }
  0x41   : > { %s136_s10 = scalar_lea.sflag (!%p130_p10), [#allocation6], %s649_s8  ;;  %s653_s12 = scalar_lea.vmem (!%p130_p10), [#allocation5], %s310_s9 }
  0x47   : > { %478 = dma.done.wait (%p585_p13), %s136_s10, 128  }
  0x48   : > { %480 = vsyncadd (%p585_p13), %s136_s10, 4294967168  ;;  %s158_s11 = sld [smem:[#allocation4 + %s499_s20]]  ;;  %s660_s13 = scalar_lea.vmem [#allocation8], %s310_s9 }
  0x4e   : > { %p312_p0 = scmp.eq.s32.totalorder %s158_s11, 0 }
  0x4f   : > { %v163_v0 = vld [vmem:[%s653_s12] sm:$0xff] (!%p312_p0) }
  0x50   : > { %162 = sbr.rel (%p312_p0) target bundleno = 87 (0x57), region = 32  ;;  %164 = vst [vmem:[%s660_s13] sm:$0xff] (!%p312_p0), %v163_v0 }
  0x57 PF: > { %p313_p2 = scmp.ne.s32.totalorder %s158_s11, 0 }
  0x58   : > { %s169_s14 = sld [smem:[#allocation3]] (!%p313_p2)  ;;  %s170_s15 = smul.u32 (!%p313_p2), 2654435769, %s499_s20  ;;  %v182_v1 = vlaneseq (!%p313_p2)  ;;  %v200_v17 = vld [vmem:[%s653_s12 + $0x4] sm:$0xf] (!%p313_p2) }
  0x59   : > { %168 = sbr.rel (%p313_p2) target bundleno = 131 (0x83), region = 36  ;;  %v205_v19 = vld [vmem:[%s653_s12] sm:$0xf] (!%p313_p2) }
  0x5a   : > { %v183_v2 = vshrl.u32 (!%p313_p2), %v182_v1, 7  ;;  %v185_v3 = vand.u32 (!%p313_p2), 127, %v182_v1 }
  0x5c   : > { %v186_v4 = vmul.u32 (!%p313_p2), 465362048, %v183_v2  ;;  %v189_v5 = vmul.u32 (!%p313_p2), 2654435769, %v185_v3 }
  0x5e   : > { %s171_s16 = sadd.s32 (!%p313_p2), %s170_s15, %s169_s14 }
  0x5f   : > { %s172_s29 = sshrl.u32 (!%p313_p2), %s171_s16, 16 }
  0x60   : > { %s173_s17 = sxor.u32 %s172_s29, %s171_s16 }
  0x61   : > { %s174_s18 = smul.u32 2146121005, %s173_s17 }
  0x63   : > { %s175_s23 = sshrl.u32 %s174_s18, 15 }
  0x64   : > { %s176_s24 = sxor.u32 %s175_s23, %s174_s18 }
  0x65   : > { %s177_s26 = smul.u32 2221713035, %s176_s24 }
  0x67   : > { %s178_s27 = sshrl.u32 %s177_s26, 16 }
  0x68   : > { %s179_s28 = sxor.u32 %s178_s27, %s177_s26 }
  0x69   : > { %v187_v6 = vstv %s179_s28 }
  0x6a   : > { %v188_v7 = vadd.s32 %v187_v6, %v186_v4 }
  0x6c   : > { %v190_v8 = vadd.s32 %v189_v5, %v188_v7 }
  0x6e   : > { %v191_v9 = vshrl.u32 %v190_v8, 16 }
  0x70   : > { %v192_v10 = vxor.u32 %v191_v9, %v190_v8 }
  0x72   : > { %v193_v11 = vmul.u32 2146121005, %v192_v10 }
  0x74   : > { %v194_v12 = vshrl.u32 %v193_v11, 15 }
  0x76   : > { %v195_v13 = vxor.u32 %v194_v12, %v193_v11 }
  0x78   : > { %v196_v14 = vmul.u32 2221713035, %v195_v13 }
  0x7a   : > { %v197_v15 = vshrl.u32 %v196_v14, 16 }
  0x7c   : > { %v198_v16 = vxor.u32 %v197_v15, %v196_v14 }
  0x7e   : > { %vm199_vm0 = vcmp.lt.u32.totalorder %v198_v16, 2147483648  ;;  %v203_v18 = vand.u32 65535, %v198_v16 }
  0x7f   : > { %v201_v20 = vsel %vm199_vm0, %v200_v17, 0.0 }
  0x80   : > { %202 = vst [vmem:[%s660_s13 + $0x4] sm:$0xf] %v201_v20  ;;  %vm204_vm1 = vcmp.lt.u32.totalorder %v203_v18, 32768 }
  0x81   : > { %v206_v21 = vsel %vm204_vm1, %v205_v19, 0.0 }
  0x82   : > { %207 = vst [vmem:[%s660_s13] sm:$0xf] %v206_v21 }
  0x83 PF: > { %s315_s6 = sshll.u32 %s499_s20, 7  ;;  %s223_s11 = sshll.u32 %s660_s13, 4  ;;  %s224_s11 = int_to_ptr.vmem [resolvable:$true] %s223_s11 }
  0x84   : > { %s673_s10 = scalar_lea.hbm %s720_s3, %s315_s6  ;;  %s209_s14 = scalar_lea.sflag [#allocation7], %s649_s8 }
  0x85   : > { %s423_s12 = scalar_lea.vmem %s224_s11, 128  ;;  %p729_p5 = scmp.ne.s32.totalorder %s724_s30, 0 }
  0x86   : > { %p424_p13 = scmp.ne.s32.totalorder %s224_s11, %s423_s12  ;;  %s511_s15 = smov [#allocation8]  }
  0x87   : > { %s427_s16 = sshll.u32 %s511_s15, 4  ;;  %s428_s16 = int_to_ptr.vmem [resolvable:$false] %s427_s16 }
  0x88   : > { %p425_p12 = pnand %p424_p13, %p729_p5  ;;  %s429_s29 = scalar_lea.vmem %s428_s16, 256 }
  0x89   : > { %p430_p8 = scmp.lt.s32.totalorder %s224_s11, %s428_s16  ;;  %p431_p11 = scmp.lt.s32.totalorder %s429_s29, %s423_s12 }
  0x8a   : > { %p426_p4 = pneg %p425_p12 }
  0x8b   : > { %p432_p9 = por %p431_p11, %p430_p8 }
  0x8d   : > { %p433_p1 = pnand %p432_p9, %p426_p4 }
  0x8f   : > { %436 = shalt.err (!%p433_p1)
}
  0x90   : > { %s437_s20 = scalar_lea.hbm %s673_s10, 128  ;;  %s441_s17 = scalar_lea.hbm %s720_s3, 256 }
  0x91   : > { %p438_p3 = scmp.ne.s32.totalorder %s673_s10, %s437_s20  ;;  %p442_p10 = scmp.lt.u32.totalorder %s673_s10, %s720_s3 }
  0x92   : > { %p443_p0 = scmp.lt.u32.totalorder %s441_s17, %s437_s20  ;;  %p445_p13 = scmp.lt.u32.totalorder %s437_s20, %s673_s10 }
  0x93   : > { %p439_p6 = pnand %p438_p3, %p729_p5 }
  0x94   : > { %p444_p2 = por %p443_p0, %p442_p10 }
  0x95   : > { %p440_p7 = pneg %p439_p6 }
  0x96   : > { %p446_p12 = por %p445_p13, %p444_p2 }
  0x98   : > { %p447_p4 = pnand %p446_p12, %p440_p7 }
  0x9a   : > { %450 = shalt.err (!%p447_p4)
}
  0x9b   : > { %320 = dma.vmem_to_hbm [thread:$0]  (%p729_p5), %s224_s11, 128, %s673_s10, %s209_s14  }
  0x9c PF: > { %s235_s24 = sand.u32 1, %s487_s0   ;;  %p730_p8 = scmp.ne.s32.totalorder %s725_s5, 0 }
  0x9d   : > { %p731_p11 = scmp.ge.s32.totalorder %s507_s22, 2  ;;  %s236_s26 = scalar_lea.sflag [#allocation7], %s235_s24 }
  0x9f   : > { %p327_p9 = pnand %p731_p11, %p730_p8 }
  0xa1   : > { %482 = dma.done.wait (!%p327_p9), %s236_s26, 128  }
  0xa2   : > { %484 = vsyncadd (!%p327_p9), %s236_s26, 4294967168  ;;  %s26_s22 = sadd.s32 1, %s507_s22   ;;  %s732_s0 = smov %s491_s1 }
  0xa3   : > { %p23_p1 = scmp.ge.s32.totalorder %s26_s22, 4   ;;  %s733_s1 = smov %s495_s19 }
  0xa4   : > { %s734_s19 = smov %s594_s4  ;;  %s735_s20 = smov %s503_s21 }
  0xa5   : > { %s736_s21 = smov %s738_s25  ;;  %25 = sbr.rel (!%p23_p1) target bundleno = 21 (0x15), region = 77 }
  0xac   :  { %241 = vsyncpa [#allocation6], 1 }
  0xad   :  { %243 = vsyncpa [#allocation6 + $0x1], 1 }
  0xae   :  { %244 = vsyncpa [#allocation7], 1 }
  0xaf   :  { %246 = vsyncpa [#allocation7 + $0x1], 1 }

</bundles_post_ra>
